<compile_context>
chip_gen: v7x
topology: tpu7x:2x2x1
jax: 0.10.0
libtpu: 0.0.40
codegen_flags: <defaults>
</compile_context>

<pallas_src>
import jax
import jax.numpy as jnp
from jax.experimental import pallas as pl
from jax.experimental.pallas import tpu as pltpu

_LANES = 128
_X_BLOCK_TARGET = 2 * 1024 * 1024   # ~2 MiB per x buffer: >=85% of measured HBM roofline
_VMEM_BUDGET = 12 * 1024 * 1024     # conservative working-set cap (fits v5e default scoped VMEM)
_VMEM_LIMIT = 32 * 1024 * 1024      # scoped-VMEM limit passed to Mosaic (safe on v5e/v6e/v7x)


def _top_kernel(x_ref, scale_ref, shift_ref, w_ref, b_ref, s_ref, o_ref, acc_ref):
    # x_ref:     [R, HW_TILE]   R = N_TILE*C rows of (batch, channel), native dtype
    # scale_ref: [R, 1]         folded BN scale per row (f32)
    # shift_ref: [R, 1]         folded BN shift per row (f32)
    # w_ref:     [R, K_PAD]     classifier weight rows (transposed, /HW folded, bf16)
    # b_ref:     [1, K_PAD]     classifier bias (zero-padded, f32)
    # s_ref:     [N_TILE, R]    group-sum selector (1 where row belongs to batch n, bf16)
    # o_ref:     [N_TILE, K_PAD] logits (lane-dense, padded)
    # acc_ref:   [R, 128]       lane-dense running post-ReLU partial sums (f32)
    j = pl.program_id(1)

    @pl.when(j == 0)
    def _init():
        acc_ref[...] = jnp.zeros_like(acc_ref)

    # BN + ReLU for this HW tile.  Kept in f32; on v6e/v7x the mul/add/max could run in
    # bf16 (bf16 VPU) to halve VALU work if the bundle dump shows VALU as the binding slot.
    x = x_ref[...].astype(jnp.float32)
    y = jnp.maximum(x * scale_ref[...] + shift_ref[...], 0.0)

    hw_t = y.shape[-1]
    if hw_t >= _LANES and hw_t % _LANES == 0:
        # Lane-dense accumulate: fold the tile down to 128 lanes with plain VPU adds
        # (no per-step XLU reduce tree, no masked single-lane stores).
        part = y[:, 0:_LANES]
        for c in range(1, hw_t // _LANES):
            part = part + y[:, c * _LANES:(c + 1) * _LANES]
        acc_ref[...] += part
    else:
        # Odd spatial sizes: one cross-lane reduce into lane 0 (other lanes stay zero).
        acc_ref[:, 0:1] += jnp.sum(y, axis=-1, keepdims=True)

    @pl.when(j == pl.num_programs(1) - 1)
    def _epilogue():
        # Single 128->1 cross-lane reduce, per-row weight scale (1/HW already folded),
        # then the tiny group-sum MXU matmul mapping (batch, channel) rows -> (batch, class).
        pooled = jnp.sum(acc_ref[...], axis=-1, keepdims=True)          # (R, 1)
        masked = pooled * w_ref[...].astype(jnp.float32)                # (R, K_PAD)
        logits = jnp.dot(s_ref[...].astype(jnp.float32), masked,
                         preferred_element_type=jnp.float32) + b_ref[...]
        o_ref[...] = logits.astype(o_ref.dtype)


def _footprint_bytes(n_tile, hw_tile, C, k_pad, x_bytes):
    rt = n_tile * C
    return (2 * rt * hw_tile * x_bytes      # x tile, double-buffered
            + 2 * 2 * rt * 4                # BN scale + shift rows (f32)
            + 2 * rt * k_pad * 2            # w_rep (bf16)
            + 2 * n_tile * rt * 2           # s_mat (bf16)
            + 2 * k_pad * 4                 # bias
            + 2 * n_tile * k_pad * 4        # output tile (f32)
            + rt * _LANES * 4)              # lane-dense accumulator scratch


def _choose_tiles(N, C, HW, x_bytes, k_pad):
    pack_mult = {1: 32, 2: 16}.get(x_bytes, 8)

    def legal(nt):
        rt = nt * C
        rows_ok = (rt % 8 == 0) or (nt == N)     # x block sublane rule
        out_ok = (nt % 8 == 0) or (nt == N)      # output block sublane rule
        return rows_ok and out_ok

    divisors = [d for d in range(1, N + 1) if N % d == 0 and legal(d)]
    if not divisors:
        divisors = [N]

    def hw_tile_for(nt):
        rt = nt * C
        # Only split HW when the full-HW slab exceeds the per-buffer byte target;
        # split tiles must be 128-multiples (lane-dense, legal BlockSpec).
        if rt * HW * x_bytes <= _X_BLOCK_TARGET:
            return HW
        best = HW
        for t in (8192, 4096, 2048, 1024, 512, 256, 128):
            if t < HW and HW % t == 0:
                best = t
                if rt * t * x_bytes <= _X_BLOCK_TARGET:
                    break
        return best

    def key(nt):
        rt = nt * C
        hw_t = hw_tile_for(nt)
        xb = rt * hw_t * x_bytes
        return (
            _footprint_bytes(nt, hw_t, C, k_pad, x_bytes) <= _VMEM_BUDGET,  # fits VMEM budget
            (N // nt >= 2) and (2 * xb >= _X_BLOCK_TARGET),   # both v7x TCs, blocks still big
            min(xb, _X_BLOCK_TARGET),                         # HBM-roofline sized DMA blocks
            rt % pack_mult == 0,                              # packed sublanes (bf16: 16 rows/vreg)
            N // nt >= 2,                                     # megacore as a weak preference
            -nt,                                              # tie-break: smaller batch tile
        )

    n_tile = max(divisors, key=key)
    hw_tile = hw_tile_for(n_tile)

    if _footprint_bytes(n_tile, hw_tile, C, k_pad, x_bytes) > _VMEM_BUDGET:
        # Nothing fits the conservative budget: pick the smallest working set and keep
        # shrinking the HW tile; vmem_limit_bytes gives extra headroom beyond the budget.
        n_tile = min(divisors,
                     key=lambda d: _footprint_bytes(d, hw_tile_for(d), C, k_pad, x_bytes))
        hw_tile = hw_tile_for(n_tile)
        while (_footprint_bytes(n_tile, hw_tile, C, k_pad, x_bytes) > _VMEM_BUDGET
               and hw_tile % 256 == 0):
            hw_tile //= 2
        # TODO(synk): pathological HW with no 128-multiple divisor can still exceed the
        # budget; padding HW in the wrapper would be the next step for such shapes.

    return n_tile, hw_tile


def top_forward(x_nchw, gamma, beta, running_mean, running_var,
                lin_w, lin_b, eps=1e-5):
    """x_nchw: [N, C, H, W] (bf16 or f32). lin_w: [K, C] (PyTorch layout). Returns [N, K] f32."""
    N, C, H, W = x_nchw.shape
    K = lin_w.shape[0]
    HW = H * W
    x_bytes = jnp.dtype(x_nchw.dtype).itemsize
    k_pad = ((K + _LANES - 1) // _LANES) * _LANES

    n_tile, hw_tile = _choose_tiles(N, C, HW, x_bytes, k_pad)
    row_tile = n_tile * C

    # Fold BN params (eval mode), plain-JAX glue.
    scale = (gamma / jnp.sqrt(running_var + eps)).astype(jnp.float32)   # [C]
    shift = (beta - running_mean * scale).astype(jnp.float32)           # [C]

    # Sublane-dense 2-D slab in the input's native dtype (no f32 upcast in HBM).
    x2d = x_nchw.reshape(N * C, HW)

    # Per-row BN params (channel pattern repeats every C rows within a block).
    scale_rows = jnp.tile(scale, n_tile).reshape(row_tile, 1)
    shift_rows = jnp.tile(shift, n_tile).reshape(row_tile, 1)

    # Classifier weight: transpose, fold 1/HW, pad K -> k_pad, replicate per row block.
    # Stored in bf16 (as is the 0/1 selector) to halve their resident VMEM/HBM footprint.
    w_t = lin_w.T.astype(jnp.float32) / HW                               # (C, K)
    w_pad = jnp.zeros((C, k_pad), jnp.float32).at[:, :K].set(w_t)
    w_rep = jnp.tile(w_pad, (n_tile, 1)).astype(jnp.bfloat16)            # (row_tile, k_pad)
    b_pad = jnp.zeros((1, k_pad), jnp.float32).at[0, :K].set(lin_b.astype(jnp.float32))
    s_mat = jnp.repeat(jnp.eye(n_tile, dtype=jnp.bfloat16), C, axis=1)   # (n_tile, row_tile)

    grid = (N // n_tile, HW // hw_tile)

    out_pad = pl.pallas_call(
        _top_kernel,
        out_shape=jax.ShapeDtypeStruct((N, k_pad), jnp.float32),
        grid=grid,
        in_specs=[
            # x is the only per-step stream; pipeline_mode=pl.Buffered(3) is a v7x option
            # if profiling shows exposed DMA after the VALU work is reduced.
            pl.BlockSpec((row_tile, hw_tile), lambda i, j: (i, j)),
            pl.BlockSpec((row_tile, 1), lambda i, j: (0, 0)),
            pl.BlockSpec((row_tile, 1), lambda i, j: (0, 0)),
            pl.BlockSpec((row_tile, k_pad), lambda i, j: (0, 0)),
            pl.BlockSpec((1, k_pad), lambda i, j: (0, 0)),
            pl.BlockSpec((n_tile, row_tile), lambda i, j: (0, 0)),
        ],
        out_specs=pl.BlockSpec((n_tile, k_pad), lambda i, j: (i, 0)),
        scratch_shapes=[pltpu.VMEM((row_tile, _LANES), jnp.float32)],
        compiler_params=pltpu.CompilerParams(
            dimension_semantics=("parallel", "arbitrary"),
            vmem_limit_bytes=_VMEM_LIMIT),
    )(x2d, scale_rows, shift_rows, w_rep, b_pad, s_mat)

    return out_pad[:, :K]


if __name__ == "__main__":
    # Small shapes consistent with the module: batch=2, in_dims=4, spatial=16x16, num_classes=10.
    N, C, H, W, K = 2, 4, 16, 16, 10

    key = jax.random.PRNGKey(0)
    k_x, k_g, k_b, k_m, k_v, k_w, k_lb = jax.random.split(key, 7)

    # Activations kept in bf16 in HBM; kernel accumulates in f32.
    x = jax.random.normal(k_x, (N, C, H, W), dtype=jnp.float32).astype(jnp.bfloat16)

    # Deterministic parameter init (synthetic, not a checkpoint).
    gamma = 1.0 + 0.1 * jax.random.normal(k_g, (C,), dtype=jnp.float32)
    beta = 0.1 * jax.random.normal(k_b, (C,), dtype=jnp.float32)
    running_mean = 0.05 * jax.random.normal(k_m, (C,), dtype=jnp.float32)
    running_var = jnp.abs(1.0 + 0.1 * jax.random.normal(k_v, (C,), dtype=jnp.float32))
    lin_w = 0.1 * jax.random.normal(k_w, (K, C), dtype=jnp.float32)   # PyTorch Linear layout [out, in]
    lin_b = 0.1 * jax.random.normal(k_lb, (K,), dtype=jnp.float32)

    logits = top_forward(x, gamma, beta, running_mean, running_var, lin_w, lin_b)
    jax.block_until_ready(logits)

    # Pure-JAX references (same bf16-quantized input, f32 math).
    xf = x.astype(jnp.float32)
    scale = gamma / jnp.sqrt(running_var + 1e-5)
    shift = beta - running_mean * scale
    y = jnp.maximum(xf * scale[None, :, None, None] + shift[None, :, None, None], 0.0)
    pooled = jnp.mean(y, axis=(2, 3))

    # Tight check: same math with the classifier weight quantized to bf16, matching the
    # kernel's bf16 weight storage (isolates kernel bugs from weight quantization).
    w_q = lin_w.astype(jnp.bfloat16).astype(jnp.float32)
    ref_q = pooled @ w_q.T + lin_b
    assert jnp.allclose(logits, ref_q, atol=1e-4, rtol=1e-4), "kernel math mismatch"

    # Module-faithful f32-weight reference; the gap is bounded by bf16 weight rounding
    # (<~1e-3 at these magnitudes), hence the wider tolerance.
    ref = pooled @ lin_w.T + lin_b
    assert jnp.allclose(logits, ref, atol=2e-3, rtol=1e-3), "mismatch vs f32 reference"

    print("KERNEL_OK")
</pallas_src>

<mosaic_0001>
module attributes {stable_mosaic.version = 11 : i64} {
  func.func @_top_kernel(%arg0: i32, %arg1: i32, %arg2: memref<8x256xbf16, #tpu.memory_space<vmem>>, %arg3: memref<8x1xf32, #tpu.memory_space<vmem>>, %arg4: memref<8x1xf32, #tpu.memory_space<vmem>>, %arg5: memref<8x128xbf16, #tpu.memory_space<vmem>>, %arg6: memref<1x128xf32, #tpu.memory_space<vmem>>, %arg7: memref<2x8xbf16, #tpu.memory_space<vmem>>, %arg8: memref<2x128xf32, #tpu.memory_space<vmem>>, %arg9: memref<8x128xf32, #tpu.memory_space<vmem>>) attributes {dimension_semantics = [#tpu.dimension_semantics<parallel>, #tpu.dimension_semantics<arbitrary>], iteration_bounds = array<i64: 1, 1>, scalar_prefetch = 0 : i64, scratch_operands = 1 : i64, tpu.core_type = #tpu.core_type<tc>, window_params = [{transform_indices = @transform_0, window_bounds = array<i64: 8, 256>}, {pipeline_mode = #tpu.pipeline_mode<synchronous>, transform_indices = @transform_1, window_bounds = array<i64: 8, 1>}, {pipeline_mode = #tpu.pipeline_mode<synchronous>, transform_indices = @transform_2, window_bounds = array<i64: 8, 1>}, {pipeline_mode = #tpu.pipeline_mode<synchronous>, transform_indices = @transform_3, window_bounds = array<i64: 8, 128>}, {pipeline_mode = #tpu.pipeline_mode<synchronous>, transform_indices = @transform_4, window_bounds = array<i64: 1, 128>}, {pipeline_mode = #tpu.pipeline_mode<synchronous>, transform_indices = @transform_5, window_bounds = array<i64: 2, 8>}, {transform_indices = @transform_6, window_bounds = array<i64: 2, 128>}]} {
    %c0_i32 = arith.constant 0 : i32
    %0 = arith.cmpi eq, %arg1, %c0_i32 : i32
    %1 = arith.extui %0 : i1 to i32
    %c0_i32_0 = arith.constant 0 : i32
    %2 = arith.cmpi ne, %1, %c0_i32_0 : i32
    scf.if %2 {
      %cst_12 = arith.constant 0.000000e+00 : f32
      %22 = vector.broadcast %cst_12 : f32 to vector<8x128xf32>
      %c0_13 = arith.constant 0 : index
      %c0_14 = arith.constant 0 : index
      %23 = vector.load %arg9[%c0_13, %c0_14] : memref<8x128xf32, #tpu.memory_space<vmem>>, vector<8x128xf32>
      tpu.vector_store %arg9[%c0_13, %c0_14], %22 {strides = array<i32>} : memref<8x128xf32, #tpu.memory_space<vmem>>, vector<8x128xf32>,
    } else {
    }
    %c0 = arith.constant 0 : index
    %c0_1 = arith.constant 0 : index
    %3 = vector.load %arg2[%c0, %c0_1] : memref<8x256xbf16, #tpu.memory_space<vmem>>, vector<8x256xbf16>
    %4 = arith.extf %3 : vector<8x256xbf16> to vector<8x256xf32>
    %c0_2 = arith.constant 0 : index
    %c0_3 = arith.constant 0 : index
    %5 = vector.load %arg3[%c0_2, %c0_3] : memref<8x1xf32, #tpu.memory_space<vmem>>, vector<8x1xf32>
    %6 = vector.broadcast %5 : vector<8x1xf32> to vector<8x256xf32>
    %7 = arith.mulf %4, %6 : vector<8x256xf32>
    %c0_4 = arith.constant 0 : index
    %c0_5 = arith.constant 0 : index
    %8 = vector.load %arg4[%c0_4, %c0_5] : memref<8x1xf32, #tpu.memory_space<vmem>>, vector<8x1xf32>
    %9 = vector.broadcast %8 : vector<8x1xf32> to vector<8x256xf32>
    %10 = arith.addf %7, %9 : vector<8x256xf32>
    %cst = arith.constant 0.000000e+00 : f32
    %11 = vector.broadcast %cst : f32 to vector<8x256xf32>
    %12 = arith.maximumf %10, %11 : vector<8x256xf32>
    %13 = vector.extract_strided_slice %12 {offsets = [0, 0], sizes = [8, 128], strides = [1, 1]} : vector<8x256xf32> to vector<8x128xf32>
    %14 = vector.extract_strided_slice %12 {offsets = [0, 128], sizes = [8, 128], strides = [1, 1]} : vector<8x256xf32> to vector<8x128xf32>
    %15 = arith.addf %13, %14 : vector<8x128xf32>
    %c0_6 = arith.constant 0 : index
    %c0_7 = arith.constant 0 : index
    %16 = vector.load %arg9[%c0_6, %c0_7] : memref<8x128xf32, #tpu.memory_space<vmem>>, vector<8x128xf32>
    %17 = arith.addf %16, %15 : vector<8x128xf32>
    %c0_8 = arith.constant 0 : index
    %c0_9 = arith.constant 0 : index
    %18 = vector.load %arg9[%c0_8, %c0_9] : memref<8x128xf32, #tpu.memory_space<vmem>>, vector<8x128xf32>
    tpu.vector_store %arg9[%c0_8, %c0_9], %17 {strides = array<i32>} : memref<8x128xf32, #tpu.memory_space<vmem>>, vector<8x128xf32>,
    %c0_i32_10 = arith.constant 0 : i32
    %19 = arith.cmpi eq, %arg1, %c0_i32_10 : i32
    %20 = arith.extui %19 : i1 to i32
    %c0_i32_11 = arith.constant 0 : i32
    %21 = arith.cmpi ne, %20, %c0_i32_11 : i32
    scf.if %21 {
      %c0_12 = arith.constant 0 : index
      %c0_13 = arith.constant 0 : index
      %22 = vector.load %arg9[%c0_12, %c0_13] : memref<8x128xf32, #tpu.memory_space<vmem>>, vector<8x128xf32>
      %cst_14 = arith.constant dense<0.000000e+00> : vector<8xf32>
      %23 = vector.multi_reduction <add>, %22, %cst_14 [1] : vector<8x128xf32> to vector<8xf32>
      %24 = vector.shape_cast %23 : vector<8xf32> to vector<8x1xf32>
      %c0_15 = arith.constant 0 : index
      %c0_16 = arith.constant 0 : index
      %25 = vector.load %arg5[%c0_15, %c0_16] : memref<8x128xbf16, #tpu.memory_space<vmem>>, vector<8x128xbf16>
      %26 = arith.extf %25 : vector<8x128xbf16> to vector<8x128xf32>
      %27 = vector.broadcast %24 : vector<8x1xf32> to vector<8x128xf32>
      %28 = arith.mulf %27, %26 : vector<8x128xf32>
      %c0_17 = arith.constant 0 : index
      %c0_18 = arith.constant 0 : index
      %29 = vector.load %arg7[%c0_17, %c0_18] : memref<2x8xbf16, #tpu.memory_space<vmem>>, vector<2x8xbf16>
      %30 = arith.extf %29 : vector<2x8xbf16> to vector<2x8xf32>
      %cst_19 = arith.constant dense<0.000000e+00> : vector<2x128xf32>
      %31 = tpu.matmul %30, %28, %cst_19 {dimension_numbers = #tpu.dot_dimension_numbers<[1], [0], [0], [1], [0, 0, 1, 1], [], []>} : vector<2x8xf32>, vector<8x128xf32>, vector<2x128xf32> -> vector<2x128xf32>
      %c0_20 = arith.constant 0 : index
      %c0_21 = arith.constant 0 : index
      %32 = vector.load %arg6[%c0_20, %c0_21] : memref<1x128xf32, #tpu.memory_space<vmem>>, vector<1x128xf32>
      %33 = vector.broadcast %32 : vector<1x128xf32> to vector<2x128xf32>
      %34 = arith.addf %31, %33 : vector<2x128xf32>
      %c0_22 = arith.constant 0 : index
      %c0_23 = arith.constant 0 : index
      %35 = vector.load %arg8[%c0_22, %c0_23] : memref<2x128xf32, #tpu.memory_space<vmem>>, vector<2x128xf32>
      tpu.vector_store %arg8[%c0_22, %c0_23], %34 {strides = array<i32>} : memref<2x128xf32, #tpu.memory_space<vmem>>, vector<2x128xf32>,
    } else {
    }
    return
  }
  func.func @transform_0(%arg0: i32, %arg1: i32) -> (i32, i32) {
    %c0_i32 = arith.constant 0 : i32
    return %arg0, %arg1 : i32, i32
  }
  func.func @transform_1(%arg0: i32, %arg1: i32) -> (i32, i32) {
    %c0_i32 = arith.constant 0 : i32
    %c0_i32_0 = arith.constant 0 : i32
    %c0_i32_1 = arith.constant 0 : i32
    return %c0_i32, %c0_i32_0 : i32, i32
  }
  func.func @transform_2(%arg0: i32, %arg1: i32) -> (i32, i32) {
    %c0_i32 = arith.constant 0 : i32
    %c0_i32_0 = arith.constant 0 : i32
    %c0_i32_1 = arith.constant 0 : i32
    return %c0_i32, %c0_i32_0 : i32, i32
  }
  func.func @transform_3(%arg0: i32, %arg1: i32) -> (i32, i32) {
    %c0_i32 = arith.constant 0 : i32
    %c0_i32_0 = arith.constant 0 : i32
    %c0_i32_1 = arith.constant 0 : i32
    return %c0_i32, %c0_i32_0 : i32, i32
  }
  func.func @transform_4(%arg0: i32, %arg1: i32) -> (i32, i32) {
    %c0_i32 = arith.constant 0 : i32
    %c0_i32_0 = arith.constant 0 : i32
    %c0_i32_1 = arith.constant 0 : i32
    return %c0_i32, %c0_i32_0 : i32, i32
  }
  func.func @transform_5(%arg0: i32, %arg1: i32) -> (i32, i32) {
    %c0_i32 = arith.constant 0 : i32
    %c0_i32_0 = arith.constant 0 : i32
    %c0_i32_1 = arith.constant 0 : i32
    return %c0_i32, %c0_i32_0 : i32, i32
  }
  func.func @transform_6(%arg0: i32, %arg1: i32) -> (i32, i32) {
    %c0_i32 = arith.constant 0 : i32
    %c0_i32_0 = arith.constant 0 : i32
    return %arg0, %c0_i32 : i32, i32
  }
}

</mosaic_0001>

<bundles_post_ra>
// kernel: tpu_custom_call.1
= control target key start
LH: loop header
LB: loop body
LE: loop exit
PB: predicated region body
PF: predicated region fallthrough
CT: control target
= control target key end

     0   :  { %v199_v1 = vmov 0   ;;  %s268_s0 = inlined_call_operand.vmem [shape: bf16[8,256], index: 0, kind: input, shape index: {}]   ;;  %s269_s1 = inlined_call_operand.vmem [shape: f32[8,1], index: 1, kind: input, shape index: {}]   ;;  %s270_s2 = inlined_call_operand.vmem [shape: f32[8,1], index: 2, kind: input, shape index: {}]   ;;  %s271_s3 = inlined_call_operand.vmem [shape: bf16[8,128], index: 3, kind: input, shape index: {}]   ;;  %s272_s4 = inlined_call_operand.vmem [shape: f32[1,128], index: 4, kind: input, shape index: {}]   ;;  %s273_s5 = inlined_call_operand.vmem [shape: bf16[2,8], index: 5, kind: input, shape index: {}]   ;;  %s274_s6 = inlined_call_operand.hbm [shape: f32[2,128], index: 6, kind: output, shape index: {}]  }
   0x1   :  { %v32_v0 = vld [vmem:[%s269_s1] sm:$0xff]  ;;  %174 = vset.pattern.permute.xlu0 %v199_v1 }
   0x2   :  { %11 = vsyncpa [#allocation4], 0  ;;  %35 = vperm.xlu0 %174, %v32_v0   ;;  %v40_v2 = vld [vmem:[%s270_s2] sm:$0xff]  ;;  %v200_v15 = vmov 0.0   ;;  %vm201_vm0 = vmmov 0   ;;  %vm72_vm1 = vcmask 64512  }
   0x3   :  { %v29_v3 = vld [vmem:[%s268_s0] sm:$0xff]  ;;  %165 = vmatprep.subr.mxu0 %v200_v15  ;;  %167 = vmatprep.mubr.msk.f32.mxu0 %vm201_vm0, %v200_v15  ;;  %s202_s30 = smov [#allocation3]  }
   0x4   :  { %v30_v4 = vunpack.c.l.bf16 %v29_v3  ;;  %v31_v5 = vunpack.c.h.bf16 %v29_v3  ;;  %v60_v16 = vld [vmem:[%s271_s3] sm:$0xf]  ;;  %s153_s7 = sshll.u32 %s202_s30, 4  ;;  %s154_s7 = int_to_ptr.vmem [resolvable:$true] %s153_s7 }
   0x5   :  { %v61_v17 = vunpack.c.l.bf16 %v60_v16  ;;  %v63_v18 = vld [vmem:[%s273_s5] sm:$0x1]  ;;  %s175_s3 = scalar_lea.vmem %s154_s7, 32  ;;  %p180_p1 = scmp.lt.s32.totalorder %s154_s7, %s154_s7 }
   0x6   :  { %43 = vperm.xlu0 %174, %v40_v2   ;;  %v64_v20 = vunpack.c.l.bf16 %v63_v18  ;;  %v161_v22 = vld [vmem:[%s272_s4] ss:$0 sm:$0xff]  ;;  %p176_p0 = scmp.ne.s32.totalorder %s154_s7, %s175_s3  ;;  %p181_p2 = scmp.lt.s32.totalorder %s175_s3, %s175_s3 }
   0x8   :  { %p182_p3 = por %p181_p2, %p180_p1 }
   0xa   :  { %p183_p4 = pnand %p182_p3, %p176_p0 }
  0x81   :  { %v36_v6 = vpop.permute.xlu0 %35 }
  0x82   :  { %v38_v7 = vmul.f32 %v36_v6, %v30_v4  ;;  %v39_v8 = vmul.f32 %v36_v6, %v31_v5 }
  0x85   :  { %v44_v9 = vpop.permute.xlu0 %43 }
  0x86   :  { %v46_v10 = vadd.f32 %v44_v9, %v38_v7  ;;  %v47_v11 = vadd.f32 %v44_v9, %v39_v8 }
  0x88   :  { %v48_v12 = vmax.f32 %v46_v10, 0.0  ;;  %v49_v13 = vmax.f32 %v47_v11, 0.0 }
  0x8a   :  { %v50_v14 = vadd.f32 %v49_v13, %v48_v12 }
  0x8c   :  { %58 = vadd.xlane.f32.xlu1 %v50_v14 }
 0x119   :  { %v59_v19 = vpop.xlane.xlu1 %58 }
 0x11a   :  { %v62_v21 = vmul.f32 %v61_v17, %v59_v19 }
 0x11c   :  { %166 = vmatpush3.msra.mxu0 %v62_v21 }
 0x11d   :  { %168 = vmatmul.mubr.msk.f32.vlgmr.msra.gmra.mrb[0].mxu0 %vm72_vm1, %v64_v20 }
 0x1f0   :  { %v142_v23 = vpop.f32.mrb[0].mxu0 }
 0x1f1   :  { %v143_v24 = vadd.f32 %v161_v22, %v142_v23  ;;  %v169_v25 = vpop.f32.mrb[1].mxu0 }
 0x1f3   :  { %146 = vst [vmem:[#allocation3] sm:$0x3] %v143_v24 }
 0x1f4   :  { %186 = shalt.err (!%p183_p4)
}
 0x1f5   :  { %s187_s9 = scalar_lea.hbm %s274_s6, 32 }
 0x1f6   :  { %p188_p5 = scmp.ne.s32.totalorder %s274_s6, %s187_s9  ;;  %p191_p6 = scmp.lt.u32.totalorder %s187_s9, %s274_s6 }
 0x1f8   :  { %p193_p7 = pnand %p191_p6, %p188_p5 }
 0x1fa   :  { %196 = shalt.err (!%p193_p7)
}
 0x1fb   :  { %156 = dma.vmem_to_hbm [thread:$0]  %s154_s7, 32, %s274_s6, [#allocation4]  }
 0x1fc   :  { %197 = dma.done.wait [#allocation4], 32  }
 0x1fd   :  { %198 = vsyncadd [#allocation4], 4294967264 }
 0x1fe   :  { %160 = vsyncpa [#allocation4], 1 }

</bundles_post_ra>
